<compile_context>
chip_gen: v5e
topology: v5e:2x2
jax: 0.10.0
libtpu: 0.0.40
codegen_flags: <defaults>
</compile_context>

<pallas_src>
import functools
import math

import jax
import jax.numpy as jnp
from jax.experimental import pallas as pl
from jax.experimental.pallas import tpu as pltpu

LN_EPS = 1e-5  # nn.LayerNorm default


def _round_up(x, m):
    return ((x + m - 1) // m) * m


def _vmem_caps():
    """Returns (physical VMEM bytes, usable budget for this kernel's buffers)."""
    try:
        phys = int(pltpu.get_tpu_info().vmem_capacity_bytes)
    except Exception:
        phys = 64 * 1024 * 1024  # conservative (v7x per-core floor)
    budget = max(phys - 16 * 1024 * 1024, 16 * 1024 * 1024)
    return phys, budget


def _maybe_single_buffered(block_shape, index_map):
    """BlockSpec for a grid-constant operand; single-buffer it when supported."""
    buffered = getattr(pl, "Buffered", None)
    if buffered is not None:
        try:
            return pl.BlockSpec(block_shape, index_map,
                                pipeline_mode=buffered(buffer_count=1))
        except TypeError:
            pass
    return pl.BlockSpec(block_shape, index_map)


def _pick_col_tile(d):
    # Largest lane-dense column tile that divides D; fall back to full width.
    for c in (512, 256, 128):
        if d >= c and d % c == 0:
            return c
    return d


def _layernorm_f32(x_ref, gamma_ref, beta_ref):
    x = x_ref[...].astype(jnp.float32)
    mean = jnp.mean(x, axis=-1, keepdims=True)
    centered = x - mean
    var = jnp.mean(centered * centered, axis=-1, keepdims=True)
    inv = jax.lax.rsqrt(var + LN_EPS)
    return (centered * inv) * gamma_ref[...].astype(jnp.float32) \
        + beta_ref[...].astype(jnp.float32)


def prenorm_resident_kernel(x_ref, gamma_ref, beta_ref, w_ref, b_ref, o_ref):
    # Whole (D, D) weight is VMEM-resident; grid = (row tiles,).
    # LN in f32; MXU operands in W's dtype (bf16 on v5e/v6e/v7x for peak);
    # f32 accumulation.  Fresh y feeds the dot directly (no scratch round trip).
    y = _layernorm_f32(x_ref, gamma_ref, beta_ref).astype(w_ref.dtype)
    out = jnp.dot(y, w_ref[...], preferred_element_type=jnp.float32)
    out = out + b_ref[...].astype(jnp.float32)
    o_ref[...] = out.astype(o_ref.dtype)


def prenorm_tiled_kernel(x_ref, gamma_ref, beta_ref, w_ref, b_ref, o_ref, y_ref):
    # Fallback for very large D: grid = (row tiles, output-column tiles),
    # column axis innermost.  LN computed once per row tile into VMEM scratch.
    j = pl.program_id(1)

    @pl.when(j == 0)
    def _():
        y_ref[...] = _layernorm_f32(x_ref, gamma_ref, beta_ref).astype(y_ref.dtype)

    out = jnp.dot(y_ref[...], w_ref[...], preferred_element_type=jnp.float32)
    out = out + b_ref[...].astype(jnp.float32)
    o_ref[...] = out.astype(o_ref.dtype)


def _row_tiling(rows, tm_target, row_align):
    """Row tile size/count: minimal padding, >=2 steps for v7x megacore."""
    tm_target = max(_round_up(min(tm_target, _round_up(rows, row_align)),
                              row_align), row_align)
    n_row = pl.cdiv(rows, tm_target)
    if rows >= 2 * row_align:
        n_row = max(n_row, 2)   # let both v7x TensorCores get row tiles
    tm_eff = _round_up(pl.cdiv(rows, n_row), row_align)
    n_row = pl.cdiv(rows, tm_eff)
    return tm_eff, n_row


@functools.partial(jax.jit,
                   static_argnames=("tm", "out_dtype", "max_resident_w_bytes"))
def prenorm_forward(x, gamma, beta, w, b, *, tm=512, out_dtype=None,
                    max_resident_w_bytes=None):
    """PreNorm(dim, Linear(dim, dim)): LayerNorm over last dim, then y @ W + b.

    x: (B, S, D).  gamma/beta/b: (D,).  w: (D, D) in y @ W layout.
    Pass W in bf16 for peak MXU throughput (LN math and accumulation stay f32).
    """
    B, S, D = x.shape
    rows = B * S
    out_dtype = x.dtype if out_dtype is None else jnp.dtype(out_dtype)

    x_isz = jnp.dtype(x.dtype).itemsize
    w_isz = jnp.dtype(w.dtype).itemsize
    o_isz = jnp.dtype(out_dtype).itemsize
    w_bytes = D * D * w_isz

    phys_cap, budget = _vmem_caps()

    # Sub-32-bit MXU operands pack two rows per sublane -> keep tm 16-aligned.
    row_align = 16 if min(x_isz, w_isz, o_isz) < 4 else 8

    x2 = x.reshape(rows, D)
    gamma2 = gamma.reshape(1, D)
    beta2 = beta.reshape(1, D)
    b2 = b.reshape(1, D)

    if max_resident_w_bytes is None:
        resident_cap = min(budget // 3, 32 * 1024 * 1024)
    else:
        resident_cap = int(max_resident_w_bytes)
    use_resident = w_bytes <= resident_cap

    if use_resident:
        # ---- Fast path: W resident in VMEM, single grid axis over rows. ----
        def est(t):
            return (w_bytes                       # W, single-buffered
                    + 2 * t * D * x_isz           # x row tile (double-buffered)
                    + 2 * t * D * o_isz           # output tile (double-buffered)
                    + 8 * D * 4)                  # gamma/beta/bias + slack

        tm_target = tm
        while tm_target > row_align and est(tm_target) > budget:
            tm_target = max(_round_up(tm_target // 2, row_align), row_align)
        tm_eff, n_row = _row_tiling(rows, tm_target, row_align)

        vmem_limit = int(min(max(2 * est(tm_eff), 32 * 1024 * 1024),
                             phys_cap - 8 * 1024 * 1024))

        out2 = pl.pallas_call(
            prenorm_resident_kernel,
            out_shape=jax.ShapeDtypeStruct((rows, D), out_dtype),
            grid_spec=pltpu.PrefetchScalarGridSpec(
                num_scalar_prefetch=0,
                grid=(n_row,),
                in_specs=[
                    pl.BlockSpec((tm_eff, D), lambda i: (i, 0)),        # x rows
                    _maybe_single_buffered((1, D), lambda i: (0, 0)),   # gamma
                    _maybe_single_buffered((1, D), lambda i: (0, 0)),   # beta
                    _maybe_single_buffered((D, D), lambda i: (0, 0)),   # W resident
                    _maybe_single_buffered((1, D), lambda i: (0, 0)),   # bias
                ],
                out_specs=pl.BlockSpec((tm_eff, D), lambda i: (i, 0)),
            ),
            compiler_params=pltpu.CompilerParams(
                dimension_semantics=("parallel",),
                vmem_limit_bytes=vmem_limit),
        )(x2, gamma2, beta2, w, b2)
    else:
        # ---- Fallback: very large D, column-tiled W with LN reuse. ----
        tn = _pick_col_tile(D)

        def est(t):
            return (2 * t * D * x_isz             # x row tile
                    + 2 * D * tn * w_isz          # W column tile
                    + 2 * t * tn * o_isz          # output tile
                    + t * D * w_isz               # LN'd-row scratch
                    + 8 * D * 4)

        # Bigger row tiles => fewer full re-reads of W from HBM.
        tm_target = max(tm, 1024)
        while tm_target > row_align and est(tm_target) > budget:
            tm_target = max(_round_up(tm_target // 2, row_align), row_align)
        tm_eff, n_row = _row_tiling(rows, tm_target, row_align)

        vmem_limit = int(min(max(2 * est(tm_eff), 32 * 1024 * 1024),
                             phys_cap - 8 * 1024 * 1024))

        out2 = pl.pallas_call(
            prenorm_tiled_kernel,
            out_shape=jax.ShapeDtypeStruct((rows, D), out_dtype),
            grid_spec=pltpu.PrefetchScalarGridSpec(
                num_scalar_prefetch=0,
                grid=(n_row, D // tn),
                in_specs=[
                    pl.BlockSpec((tm_eff, D), lambda i, j: (i, 0)),   # x rows
                    pl.BlockSpec((1, D), lambda i, j: (0, 0)),        # gamma
                    pl.BlockSpec((1, D), lambda i, j: (0, 0)),        # beta
                    pl.BlockSpec((D, tn), lambda i, j: (0, j)),       # W column tile
                    pl.BlockSpec((1, tn), lambda i, j: (0, j)),       # bias tile
                ],
                out_specs=pl.BlockSpec((tm_eff, tn), lambda i, j: (i, j)),
                scratch_shapes=[pltpu.VMEM((tm_eff, D), w.dtype)],    # LN'd rows
            ),
            compiler_params=pltpu.CompilerParams(
                dimension_semantics=("parallel", "arbitrary"),
                vmem_limit_bytes=vmem_limit),
        )(x2, gamma2, beta2, w, b2)

    return out2.reshape(B, S, D)


def reference_forward(x, gamma, beta, w, b):
    """Pure-JAX reference matching the kernel's numeric path (f32 LN, matmul
    operands in W's dtype, f32 accumulate)."""
    xf = x.astype(jnp.float32)
    mean = jnp.mean(xf, axis=-1, keepdims=True)
    var = jnp.mean((xf - mean) ** 2, axis=-1, keepdims=True)
    y = (xf - mean) * jax.lax.rsqrt(var + LN_EPS)
    y = y * gamma.astype(jnp.float32) + beta.astype(jnp.float32)
    yk = y.astype(w.dtype).astype(jnp.float32)
    out = yk @ w.astype(jnp.float32) + b.astype(jnp.float32)
    return out.astype(x.dtype)


# TODO(synk): the original module wraps an arbitrary `fn: nn.Module`; only the
# canonical fn = nn.Linear(dim, dim) is fused here.

if __name__ == "__main__":
    # --- Check 1: small f32 problem (tight tolerance), resident-W path ---
    B, S, D = 2, 8, 32
    kx, kw, kb = jax.random.split(jax.random.PRNGKey(0), 3)
    x = jax.random.normal(kx, (B, S, D), dtype=jnp.float32)
    gamma = jnp.ones((D,), dtype=jnp.float32)          # nn.LayerNorm defaults
    beta = jnp.zeros((D,), dtype=jnp.float32)
    w = jax.random.normal(kw, (D, D), dtype=jnp.float32) * (1.0 / math.sqrt(D))
    b = jax.random.normal(kb, (D,), dtype=jnp.float32) * 0.01

    out = jax.block_until_ready(prenorm_forward(x, gamma, beta, w, b))
    ref = reference_forward(x, gamma, beta, w, b)
    assert out.shape == (B, S, D)
    assert jnp.allclose(out, ref, atol=1e-4, rtol=1e-4)

    # --- Check 2: ragged row tiling + bf16 MXU path, resident W ---
    B2, S2, D2 = 2, 136, 256           # rows=272 -> 2 row tiles of 144 (ragged)
    k1, k2, k3, k4, k5 = jax.random.split(jax.random.PRNGKey(1), 5)
    xb = jax.random.normal(k1, (B2, S2, D2), dtype=jnp.float32)
    gb = 1.0 + 0.1 * jax.random.normal(k2, (D2,), dtype=jnp.float32)
    bb = 0.1 * jax.random.normal(k3, (D2,), dtype=jnp.float32)
    wb = (jax.random.normal(k4, (D2, D2), dtype=jnp.float32)
          * (1.0 / math.sqrt(D2))).astype(jnp.bfloat16)
    bias_b = 0.01 * jax.random.normal(k5, (D2,), dtype=jnp.float32)

    out_b = jax.block_until_ready(prenorm_forward(xb, gb, bb, wb, bias_b))
    ref_b = reference_forward(xb, gb, bb, wb, bias_b)
    assert out_b.shape == (B2, S2, D2)
    assert jnp.allclose(out_b, ref_b, atol=2e-2, rtol=2e-2)

    # --- Check 3: force the column-tiled fallback path (large-D code path) ---
    B3, S3, D3 = 2, 136, 384           # tn=128 -> 3 column tiles, 2 row tiles
    k6, k7, k8, k9, k10 = jax.random.split(jax.random.PRNGKey(2), 5)
    xc = jax.random.normal(k6, (B3, S3, D3), dtype=jnp.float32)
    gc = 1.0 + 0.1 * jax.random.normal(k7, (D3,), dtype=jnp.float32)
    bc = 0.1 * jax.random.normal(k8, (D3,), dtype=jnp.float32)
    wc = jax.random.normal(k9, (D3, D3), dtype=jnp.float32) * (1.0 / math.sqrt(D3))
    bias_c = 0.01 * jax.random.normal(k10, (D3,), dtype=jnp.float32)

    out_c = jax.block_until_ready(
        prenorm_forward(xc, gc, bc, wc, bias_c, max_resident_w_bytes=0))
    ref_c = reference_forward(xc, gc, bc, wc, bias_c)
    assert out_c.shape == (B3, S3, D3)
    assert jnp.allclose(out_c, ref_c, atol=2e-3, rtol=2e-3)

    print("KERNEL_OK")
</pallas_src>

<mosaic_0001>
module attributes {stable_mosaic.version = 11 : i64} {
  func.func @prenorm_resident_kernel(%arg0: i32, %arg1: memref<8x32xf32, #tpu.memory_space<vmem>>, %arg2: memref<1x32xf32, #tpu.memory_space<vmem>>, %arg3: memref<1x32xf32, #tpu.memory_space<vmem>>, %arg4: memref<32x32xf32, #tpu.memory_space<vmem>>, %arg5: memref<1x32xf32, #tpu.memory_space<vmem>>, %arg6: memref<8x32xf32, #tpu.memory_space<vmem>>) attributes {dimension_semantics = [#tpu.dimension_semantics<parallel>], iteration_bounds = array<i64: 2>, scalar_prefetch = 0 : i64, scratch_operands = 0 : i64, tpu.core_type = #tpu.core_type<tc>, window_params = [{transform_indices = @transform_0, window_bounds = array<i64: 8, 32>}, {pipeline_mode = #tpu.pipeline_mode<synchronous>, transform_indices = @transform_1, window_bounds = array<i64: 1, 32>}, {pipeline_mode = #tpu.pipeline_mode<synchronous>, transform_indices = @transform_2, window_bounds = array<i64: 1, 32>}, {pipeline_mode = #tpu.pipeline_mode<synchronous>, transform_indices = @transform_3, window_bounds = array<i64: 32, 32>}, {pipeline_mode = #tpu.pipeline_mode<synchronous>, transform_indices = @transform_4, window_bounds = array<i64: 1, 32>}, {transform_indices = @transform_5, window_bounds = array<i64: 8, 32>}]} {
    %c0 = arith.constant 0 : index
    %c0_0 = arith.constant 0 : index
    %0 = vector.load %arg1[%c0, %c0_0] : memref<8x32xf32, #tpu.memory_space<vmem>>, vector<8x32xf32>
    %cst = arith.constant dense<0.000000e+00> : vector<8xf32>
    %1 = vector.multi_reduction <add>, %0, %cst [1] : vector<8x32xf32> to vector<8xf32>
    %2 = vector.shape_cast %1 : vector<8xf32> to vector<8x1xf32>
    %cst_1 = arith.constant 3.200000e+01 : f32
    %3 = vector.broadcast %cst_1 : f32 to vector<8x1xf32>
    %4 = arith.divf %2, %3 : vector<8x1xf32>
    %5 = vector.broadcast %4 : vector<8x1xf32> to vector<8x32xf32>
    %6 = arith.subf %0, %5 : vector<8x32xf32>
    %7 = arith.mulf %6, %6 : vector<8x32xf32>
    %cst_2 = arith.constant dense<0.000000e+00> : vector<8xf32>
    %8 = vector.multi_reduction <add>, %7, %cst_2 [1] : vector<8x32xf32> to vector<8xf32>
    %9 = vector.shape_cast %8 : vector<8xf32> to vector<8x1xf32>
    %cst_3 = arith.constant 3.200000e+01 : f32
    %10 = vector.broadcast %cst_3 : f32 to vector<8x1xf32>
    %11 = arith.divf %9, %10 : vector<8x1xf32>
    %cst_4 = arith.constant 9.99999974E-6 : f32
    %12 = vector.broadcast %cst_4 : f32 to vector<8x1xf32>
    %13 = arith.addf %11, %12 : vector<8x1xf32>
    %14 = math.rsqrt %13 : vector<8x1xf32>
    %15 = vector.broadcast %14 : vector<8x1xf32> to vector<8x32xf32>
    %16 = arith.mulf %6, %15 : vector<8x32xf32>
    %c0_5 = arith.constant 0 : index
    %c0_6 = arith.constant 0 : index
    %17 = vector.load %arg2[%c0_5, %c0_6] : memref<1x32xf32, #tpu.memory_space<vmem>>, vector<1x32xf32>
    %18 = vector.broadcast %17 : vector<1x32xf32> to vector<8x32xf32>
    %19 = arith.mulf %16, %18 : vector<8x32xf32>
    %c0_7 = arith.constant 0 : index
    %c0_8 = arith.constant 0 : index
    %20 = vector.load %arg3[%c0_7, %c0_8] : memref<1x32xf32, #tpu.memory_space<vmem>>, vector<1x32xf32>
    %21 = vector.broadcast %20 : vector<1x32xf32> to vector<8x32xf32>
    %22 = arith.addf %19, %21 : vector<8x32xf32>
    %c0_9 = arith.constant 0 : index
    %c0_10 = arith.constant 0 : index
    %23 = vector.load %arg4[%c0_9, %c0_10] : memref<32x32xf32, #tpu.memory_space<vmem>>, vector<32x32xf32>
    %cst_11 = arith.constant dense<0.000000e+00> : vector<8x32xf32>
    %24 = tpu.matmul %22, %23, %cst_11 {dimension_numbers = #tpu.dot_dimension_numbers<[1], [0], [0], [1], [0, 0, 1, 1], [], []>} : vector<8x32xf32>, vector<32x32xf32>, vector<8x32xf32> -> vector<8x32xf32>
    %c0_12 = arith.constant 0 : index
    %c0_13 = arith.constant 0 : index
    %25 = vector.load %arg5[%c0_12, %c0_13] : memref<1x32xf32, #tpu.memory_space<vmem>>, vector<1x32xf32>
    %26 = vector.broadcast %25 : vector<1x32xf32> to vector<8x32xf32>
    %27 = arith.addf %24, %26 : vector<8x32xf32>
    %c0_14 = arith.constant 0 : index
    %c0_15 = arith.constant 0 : index
    %28 = vector.load %arg6[%c0_14, %c0_15] : memref<8x32xf32, #tpu.memory_space<vmem>>, vector<8x32xf32>
    tpu.vector_store %arg6[%c0_14, %c0_15], %27 {strides = array<i32>} : memref<8x32xf32, #tpu.memory_space<vmem>>, vector<8x32xf32>,
    return
  }
  func.func @transform_0(%arg0: i32) -> (i32, i32) {
    %c0_i32 = arith.constant 0 : i32
    %c0_i32_0 = arith.constant 0 : i32
    return %arg0, %c0_i32 : i32, i32
  }
  func.func @transform_1(%arg0: i32) -> (i32, i32) {
    %c0_i32 = arith.constant 0 : i32
    %c0_i32_0 = arith.constant 0 : i32
    %c0_i32_1 = arith.constant 0 : i32
    return %c0_i32, %c0_i32_0 : i32, i32
  }
  func.func @transform_2(%arg0: i32) -> (i32, i32) {
    %c0_i32 = arith.constant 0 : i32
    %c0_i32_0 = arith.constant 0 : i32
    %c0_i32_1 = arith.constant 0 : i32
    return %c0_i32, %c0_i32_0 : i32, i32
  }
  func.func @transform_3(%arg0: i32) -> (i32, i32) {
    %c0_i32 = arith.constant 0 : i32
    %c0_i32_0 = arith.constant 0 : i32
    %c0_i32_1 = arith.constant 0 : i32
    return %c0_i32, %c0_i32_0 : i32, i32
  }
  func.func @transform_4(%arg0: i32) -> (i32, i32) {
    %c0_i32 = arith.constant 0 : i32
    %c0_i32_0 = arith.constant 0 : i32
    %c0_i32_1 = arith.constant 0 : i32
    return %c0_i32, %c0_i32_0 : i32, i32
  }
  func.func @transform_5(%arg0: i32) -> (i32, i32) {
    %c0_i32 = arith.constant 0 : i32
    %c0_i32_0 = arith.constant 0 : i32
    return %arg0, %c0_i32 : i32, i32
  }
}

</mosaic_0001>

<bundles_post_ra>
// kernel: prenorm_forward.1
= control target key start
LH: loop header
LB: loop body
LE: loop exit
PB: predicated region body
PF: predicated region fallthrough
CT: control target
= control target key end

     0   :  { %10 = vsyncpa [#allocation3], 0  ;;  %s829_s0 = inlined_call_operand.hbm [shape: f32[16,32], index: 0, kind: input, shape index: {}]   ;;  %s830_s1 = inlined_call_operand.vmem [shape: f32[1,32], index: 1, kind: input, shape index: {}]   ;;  %s831_s2 = inlined_call_operand.vmem [shape: f32[1,32], index: 2, kind: input, shape index: {}]   ;;  %s832_s3 = inlined_call_operand.hbm [shape: f32[32,32], index: 3, kind: input, shape index: {}]   ;;  %s833_s4 = inlined_call_operand.vmem [shape: f32[1,32], index: 4, kind: input, shape index: {}]   ;;  %s834_s5 = inlined_call_operand.hbm [shape: f32[16,32], index: 5, kind: output, shape index: {}]  }
   0x1   :  { %12 = vsyncpa [#allocation3 + $0x1], 0 }
   0x2   :  { %13 = vsyncpa [#allocation6], 0 }
   0x3   :  { %14 = vsyncpa [#allocation4], 0 }
   0x4   :  { %16 = vsyncpa [#allocation4 + $0x1], 0  ;;  %s676_s18 = smov 0   ;;  %s678_s19 = smov 0  }
   0x5   :  { %s680_s20 = smov 0   ;;  %s682_s21 = smov 0  }
   0x6 LB: > { %s180_s24 = sshll.u32 %s832_s3, 4  ;;  %s700_s25 = sadd.s32 4294967295, %s640_s21   ;;  %s640_s21 = sphi %s682_s21, %s844_s21   ;;  %s636_s20 = sphi %s680_s20, %s843_s20   ;;  %s632_s19 = sphi %s678_s19, %s842_s19   ;;  %s628_s18 = sphi %s676_s18, %s841_s18   ;;  %s181_s24 = int_to_ptr.hbm [resolvable:$true] %s180_s24 }
   0x7   : > { %p429_p0 = scmp.ge.s32.totalorder %s640_s21, 1  ;;  %p43_p1 = scmp.eq.s32.totalorder %s700_s25, 0 }
   0x8   : > { %p163_p2 = scmp.lt.s32.totalorder %s640_s21, 3  ;;  %s642_s27 = smov [#allocation5]  }
   0x9   : > { %s182_s28 = sshll.u32 %s642_s27, 4  ;;  %s643_s29 = smov 128   ;;  %s183_s28 = int_to_ptr.vmem [resolvable:$true] %s182_s28 }
   0xa   : > { %p705_p3 = pnand %p429_p0, %p163_p2  ;;  %s644_s30 = smov 8  }
   0xb   : > { %s428_s6 = sadd.s32 4294967294, %s640_s21   ;;  %s716_s7 = sadd.s32 1, %s640_s21  }
   0xc   : > { %p451_p4 = pneg %p705_p3  ;;  %s29_s8 = sadd.s32 1, %s636_s20 }
   0xd   : > { %s26_s9 = ssub.s32 %s640_s21, %s716_s7  ;;  %p36_p7 = scmp.ne.s32.totalorder %s636_s20, %s632_s19 }
   0xe   : > { %p452_p6 = pnand %p451_p4, %p43_p1  ;;  %p27_p8 = scmp.eq.s32.totalorder %s26_s9, 0 }
   0xf   : > { %p37_p9 = scmp.eq.s32.totalorder %s640_s21, 0  ;;  %p42_p10 = scmp.ne.s32.totalorder %s632_s19, %s628_s18 }
  0x10   : > { %454 = dma.hbm_to_vmem [thread:$0]  (!%p452_p6), %s181_s24, 512, %s183_s28, [#allocation6], %s643_s29, %s643_s29, %s644_s30  }
  0x11   : > { %p150_p11 = scmp.eq.s32.totalorder %s700_s25, 1  ;;  %p732_p12 = por %p43_p1, %p42_p10 }
  0x12   : > { %s728_s10 = scalar_select %p27_p8, %s636_s20, %s29_s8  }
  0x13   : > { %p736_p13 = por %p150_p11, %p36_p7  ;;  %p156_p0 = scmp.eq.s32.totalorder %s428_s6, 1 }
  0x14   : > { %p38_p2 = por %p37_p9, %p36_p7  ;;  %s199_s13 = sand.u32 1, %s636_s20  }
  0x15   : > { %p741_p4 = por %p156_p0, %p42_p10  ;;  %p464_p6 = scmp.lt.s32.totalorder %s640_s21, 2 }
  0x16   : > { %s432_s15 = sshll.u32 %s199_s13, 3  ;;  %s433_s16 = sshll.u32 %s640_s21, 3 }
  0x17   : > { %s207_s23 = scalar_lea.hbm %s829_s0, %s433_s16  ;;  %s203_s27 = scalar_lea.vmem [#allocation2], %s432_s15 }
  0x18   : > { %s209_s24 = sshll.u32 %s207_s23, 4  ;;  %s211_s28 = sshll.u32 %s203_s27, 4  ;;  %s210_s24 = int_to_ptr.hbm [resolvable:$true] %s209_s24  ;;  %s212_s28 = int_to_ptr.vmem [resolvable:$true] %s211_s28 }
  0x19   : > { %p750_p8 = pnand %p464_p6, %p38_p2  ;;  %s200_s30 = scalar_lea.sflag [#allocation3], %s199_s13 }
  0x1a   : > { %s540_s6 = sshra.s32 %s210_s24, 4  ;;  %s547_s15 = scalar_lea.hbm %s829_s0, 16  ;;  %s541_s6 = int_to_ptr.hbm [resolvable:$true] %s540_s6 }
  0x1b   : > { %s542_s8 = scalar_lea.hbm %s541_s6, 8  ;;  %p544_p9 = pneg %p750_p8 }
  0x1c   : > { %p543_p7 = scmp.ne.s32.totalorder %s541_s6, %s542_s8  ;;  %p548_p0 = scmp.lt.s32.totalorder %s541_s6, %s829_s0 }
  0x1d   : > { %p549_p2 = scmp.lt.s32.totalorder %s547_s15, %s542_s8 }
  0x1e   : > { %p545_p10 = pnand %p544_p9, %p543_p7 }
  0x1f   : > { %p550_p6 = por %p549_p2, %p548_p0 }
  0x20   : > { %p546_p11 = pneg %p545_p10 }
  0x22   : > { %p551_p5 = pnand %p550_p6, %p546_p11 }
  0x24   : > { %554 = shalt.err (!%p551_p5)
}
  0x25   : > { %458 = dma.hbm_to_vmem [thread:$0]  (!%p750_p8), %s210_s24, 128, %s212_s28, %s200_s30  }
  0x26   : > { %220 = sbr.rel (%p705_p3) target bundleno = 446 (0x1be), region = 40  ;;  %s767_s13 = sand.u32 (!%p705_p3), 1, %s632_s19  }
  0x27   : > { %s435_s23 = sshll.u32 (!%p705_p3), %s767_s13, 3  ;;  %s223_s27 = scalar_lea.sflag (!%p705_p3), [#allocation3], %s767_s13 }
  0x28   : > { %s226_s6 = scalar_lea.vmem (!%p705_p3), [#allocation2], %s435_s23 }
  0x2b   : > { %615 = dma.done.wait (%p732_p12), %s223_s27, 128  }
  0x2c   : > { %617 = vsyncadd (%p732_p12), %s223_s27, 4294967168 }
  0x2d   : > { %619 = dma.done.wait (%p43_p1), [#allocation6], 512  }
  0x2e   : > { %621 = vsyncadd (%p43_p1), [#allocation6], 4294966784  ;;  %vm260_vm0 = vcmask 261120   ;;  %v259_v0 = vld [vmem:[%s226_s6] sm:$0xff]  ;;  %v645_v2 = vmov 32.0   ;;  %v301_v16 = vld [vmem:[#allocation5 + $0x8] sm:$0xff] }
  0x2f   : > { %v261_v1 = vsel %vm260_vm0, %v259_v0, 0.0  ;;  %506 = vrcp.f32 %v645_v2  ;;  %v303_v14 = vld [vmem:[#allocation5 + $0x18] sm:$0xff]  ;;  %v302_v15 = vld [vmem:[#allocation5 + $0x10] sm:$0xff]  ;;  %v300_v17 = vld [vmem:[#allocation5] sm:$0xff]  ;;  %s440_s29 = sshll.u32 %s700_s25, 3  ;;  %s258_s17 = scalar_lea.vmem [#allocation7], %s435_s23 }
  0x30   : > { %262 = vadd.xlane.f32.xlu0 %v261_v1  ;;  %323 = vmatpush.msra.mxu0 %v303_v14  ;;  %v503_v27 = vld [vmem:[%s830_s1] ss:$0 sm:$0xff]  ;;  %s343_s9 = scalar_lea.hbm %s834_s5, %s440_s29  ;;  %s345_s22 = sshll.u32 %s258_s17, 4  ;;  %s346_s22 = int_to_ptr.vmem [resolvable:$true] %s345_s22 }
  0x31   : > { %v504_v30 = vld [vmem:[%s831_s2] ss:$0 sm:$0xff]  ;;  %s347_s27 = sshll.u32 %s343_s9, 4  ;;  %s333_s25 = scalar_lea.sflag [#allocation4], %s767_s13  ;;  %s348_s27 = int_to_ptr.hbm [resolvable:$true] %s347_s27 }
  0x32   : > { %324 = vmatpush.msra.mxu0 %v302_v15  ;;  %v505_v33 = vld [vmem:[%s833_s4] ss:$0 sm:$0xff]  ;;  %s584_s6 = sshra.s32 %s348_s27, 4  ;;  %s590_s23 = scalar_lea.hbm %s834_s5, 16  ;;  %s585_s6 = int_to_ptr.hbm [resolvable:$true] %s584_s6 }
  0x33   : > { %s586_s26 = scalar_lea.hbm %s585_s6, 8  ;;  %p591_p12 = scmp.lt.s32.totalorder %s585_s6, %s834_s5 }
  0x34   : > { %325 = vmatpush.msra.mxu0 %v301_v16  ;;  %p587_p1 = scmp.ne.s32.totalorder %s585_s6, %s586_s26  ;;  %p592_p8 = scmp.lt.s32.totalorder %s590_s23, %s586_s26 }
  0x35   : > { %v507_v3 = vpop.eup %506 }
  0x36   : > { %v265_v4 = vmul.f32 32.0, %v507_v3  ;;  %vm269_vm1 = vweird.f32 %v507_v3  ;;  %326 = vmatpush.msra.mxu0 %v300_v17  ;;  %p588_p3 = pnand %p587_p1, %p736_p13  ;;  %p593_p7 = por %p592_p8, %p591_p12 }
  0x38   : > { %v266_v5 = vsub.f32 1.0, %v265_v4  ;;  %p589_p5 = pneg %p588_p3 }
  0x3a   : > { %v267_v6 = vmul.f32 %v507_v3, %v266_v5  ;;  %p594_p9 = pnand %p593_p7, %p589_p5 }
  0x3c   : > { %v268_v7 = vadd.f32 %v507_v3, %v267_v6 }
  0x3e   : > { %v270_v8 = vsel %vm269_vm1, %v507_v3, %v268_v7 }
  0xa3   : > { %v263_v9 = vpop.xlane.xlu0 %262 }
  0xa4   : > { %v271_v10 = vmul.f32 %v270_v8, %v263_v9 }
  0xa6   : > { %v272_v11 = vsub.f32 %v259_v0, %v271_v10 }
  0xa8   : > { %v273_v12 = vmul.f32 %v272_v11, %v272_v11 }
  0xaa   : > { %v274_v13 = vsel %vm260_vm0, %v273_v12, 0.0 }
  0xab   : > { %275 = vadd.xlane.f32.xlu0 %v274_v13 }
 0x11e   : > { %v276_v18 = vpop.xlane.xlu0 %275 }
 0x11f   : > { %v277_v19 = vmul.f32 %v276_v18, %v270_v8 }
 0x121   : > { %v278_v20 = vadd.f32 1e-05, %v277_v19 }
 0x123   : > { %508 = vrsqrt.f32 %v278_v20  ;;  %vm285_vm3 = vweird.f32 %v278_v20 }
 0x129   : > { %v509_v21 = vpop.eup %508 }
 0x12a   : > { %v280_v22 = vmul.f32 %v509_v21, %v278_v20  ;;  %vm286_vm2 = vweird.f32 %v509_v21 }
 0x12b   : > { %vm287_vm4 = vmor %vm285_vm3, %vm286_vm2 }
 0x12c   : > { %v281_v23 = vmul.f32 %v509_v21, %v280_v22 }
 0x12e   : > { %v282_v24 = vmul.f32 0.5, %v281_v23 }
 0x130   : > { %v283_v25 = vsub.f32 1.5, %v282_v24 }
 0x132   : > { %v284_v26 = vmul.f32 %v509_v21, %v283_v25 }
 0x134   : > { %v288_v28 = vsel %vm287_vm4, %v509_v21, %v284_v26 }
 0x135   : > { %v289_v29 = vmul.f32 %v288_v28, %v272_v11 }
 0x137   : > { %v294_v31 = vmul.f32 %v503_v27, %v289_v29 }
 0x139   : > { %v299_v32 = vadd.f32 %v504_v30, %v294_v31 }
 0x13b   : > { %438 = vmatmul.msk.f32.vlgmr.msra.gmra.mxu0 %vm260_vm0, %v299_v32 }
 0x1b8   : > { %v328_v34 = vpop.f32.mrf.mxu0 }
 0x1b9   : > { %v329_v35 = vadd.f32 %v505_v33, %v328_v34 }
 0x1bb   : > { %331 = vst.msk [vmem:[%s258_s17] sm:$0xff] %vm260_vm0, %v329_v35 }
 0x1bc   : > { %597 = shalt.err (!%p594_p9)
}
 0x1bd   : > { %449 = dma.vmem_to_hbm [thread:$0]  (%p736_p13), %s346_s22, 128, %s348_s27, %s333_s25  }
 0x1be PF: > { %s359_s13 = sand.u32 1, %s628_s18   ;;  %p840_p10 = scmp.ge.s32.totalorder %s640_s21, 2 }
 0x1bf   : > { %s360_s30 = scalar_lea.sflag [#allocation4], %s359_s13 }
 0x1c0   : > { %p460_p11 = pnand %p840_p10, %p741_p4 }
 0x1c2   : > { %p461_p0 = pneg %p460_p11 }
 0x1c4   : > { %623 = dma.done.wait (%p461_p0), %s360_s30, 128  }
 0x1c5   : > { %625 = vsyncadd (%p461_p0), %s360_s30, 4294967168  ;;  %p19_p2 = scmp.ge.s32.totalorder %s716_s7, 4   ;;  %s841_s18 = smov %s632_s19 }
 0x1c6   : > { %s842_s19 = smov %s636_s20  ;;  %s843_s20 = smov %s728_s10 }
 0x1c7   : > { %s844_s21 = smov %s716_s7  ;;  %21 = sbr.rel (!%p19_p2) target bundleno = 6 (0x6), region = 89 }
 0x1cc   :  { %366 = vsyncpa [#allocation3], 1 }
 0x1cd   :  { %368 = vsyncpa [#allocation3 + $0x1], 1 }
 0x1ce   :  { %369 = vsyncpa [#allocation6], 1 }
 0x1cf   :  { %370 = vsyncpa [#allocation4], 1 }
 0x1d0   :  { %372 = vsyncpa [#allocation4 + $0x1], 1 }

</bundles_post_ra>
